<compile_context>
chip_gen: v5e
topology: v5e:2x2
jax: 0.10.0
libtpu: 0.0.40
codegen_flags: <defaults>
</compile_context>

<pallas_src>
import functools

import jax
import jax.numpy as jnp
from jax.experimental import pallas as pl
from jax.experimental.pallas import tpu as pltpu

LN_EPS = 1e-12                       # DistilBERT LayerNorm epsilon
_SQRT_2_OVER_PI = 0.7978845608028654

# Inter-kernel activations carried in bf16 (halves HBM traffic on the
# memory-bound LN/residual paths); LayerNorm stats stay f32 inside kernels.
_ACT_DTYPE = jnp.bfloat16


# --------------------------- VMEM budget / tiling ----------------------------
def _vmem_limit_bytes():
    """Explicit scoped-VMEM limit: ~75% of physical, capped at 100 MiB.

    => ~96-100 MiB on v5e/v6e (128 MiB parts), ~48 MiB on v7x (64 MiB part),
    instead of the 16/32 MiB defaults that would force tiny tiles (or fail)
    at real DistilBERT shapes.
    """
    try:
        cap = int(pltpu.get_tpu_info().vmem_capacity_bytes)
    except Exception:
        cap = 128 * 1024 * 1024
    return min(100 * 1024 * 1024, (cap * 3) // 4)


_VMEM_LIMIT_BYTES = _vmem_limit_bytes()
# Row-tile target for token-parallel kernels, derived from the VMEM budget:
# 512 rows when we have ~100 MiB to play with (v5e/v6e), 256 on v7x-class
# budgets so resident FFN weights + intermediates + double-buffered tiles fit.
_M_TILE_TARGET = 512 if _VMEM_LIMIT_BYTES >= 96 * 1024 * 1024 else 256


def _compiler_params(*sem):
    return pltpu.CompilerParams(dimension_semantics=tuple(sem),
                                vmem_limit_bytes=_VMEM_LIMIT_BYTES)


def _row_tiling(m):
    """(tile, grid_steps) for token-parallel kernels.

    Tiles are multiples of 16 (bf16 sublane packing) or the full m; the grid
    uses cdiv so an indivisible m still compiles (partial last block: reads
    padded, out-of-range writes dropped) instead of silently falling back to
    a single oversized block.
    """
    if m > _M_TILE_TARGET:
        tm = _M_TILE_TARGET
    elif m >= 32 and m % 32 == 0:
        tm = m // 2              # >=2 blocks so v7x's two TensorCores both work
    else:
        tm = m
    return tm, pl.cdiv(m, tm)


# -------------------- single-buffered resident-weight specs -------------------
_SINGLE_BUFFER_OK = None


def _sb_probe_kernel(x_ref, o_ref):
    o_ref[...] = x_ref[...] + 1.0


def _single_buffer_ok():
    """Probe once whether pipeline_mode=pl.Buffered(1) is supported here."""
    global _SINGLE_BUFFER_OK
    if _SINGLE_BUFFER_OK is None:
        try:
            fn = pl.pallas_call(
                _sb_probe_kernel,
                out_shape=jax.ShapeDtypeStruct((8, 128), jnp.float32),
                grid=(1,),
                in_specs=[pl.BlockSpec((8, 128), lambda i: (0, 0),
                                       pipeline_mode=pl.Buffered(1))],
                out_specs=pl.BlockSpec((8, 128), lambda i: (0, 0)),
                compiler_params=_compiler_params("arbitrary"),
            )
            jax.block_until_ready(fn(jnp.zeros((8, 128), jnp.float32)))
            _SINGLE_BUFFER_OK = True
        except Exception:
            _SINGLE_BUFFER_OK = False
    return _SINGLE_BUFFER_OK


def _resident_spec(shape, index_map):
    """BlockSpec for a weight/bias whose block index never changes.

    Single-buffered when supported: the second pipeline buffer is pure VMEM
    waste for a constant-index operand (halves resident-weight VMEM, the
    difference between fitting and not fitting on v7x's 64 MiB).
    """
    if _single_buffer_ok():
        return pl.BlockSpec(shape, index_map, pipeline_mode=pl.Buffered(1))
    return pl.BlockSpec(shape, index_map)


# ----------------------------- in-kernel math --------------------------------
def _gelu_tanh(x):
    # tanh-form GELU: the transcendental lowers to the EUP slot instead of a
    # ~12-op VALU erf polynomial.  Deviates ~1e-3 from torch.nn.GELU's exact
    # erf form (documented tradeoff).  Computed in the dtype of x (bf16 in the
    # FFN, halving the (TM, ffn) VMEM temporary).
    # TODO(synk): on v5e (no bf16 VPU/EUP) the bf16 path adds cast overhead;
    # gate the intermediate dtype on chip generation if v5e matters.
    return 0.5 * x * (1.0 + jnp.tanh(_SQRT_2_OVER_PI * (x + 0.044715 * x * x * x)))


def _layernorm(h, g, b):
    # float32 statistics, biased variance, eps = 1e-12 (DistilBERT).
    mu = jnp.mean(h, axis=-1, keepdims=True)
    var = jnp.mean(jnp.square(h - mu), axis=-1, keepdims=True)
    return (h - mu) * jax.lax.rsqrt(var + LN_EPS) * g + b


# ------------------------------ Pallas kernels -------------------------------
def _embed_ln_kernel(x_ref, pos_ref, g_ref, b_ref, o_ref):
    # o = LayerNorm(inputs_embeds + position_embeddings); pos is (S, D), not a
    # (B, S, D) broadcast, so the table is read once per batch block only.
    h = x_ref[0].astype(jnp.float32) + pos_ref[...].astype(jnp.float32)
    o_ref[0] = _layernorm(h, g_ref[...], b_ref[...]).astype(o_ref.dtype)


def _ffn_kernel(x_ref, w1_ref, b1_ref, w2_ref, b2_ref, g_ref, be_ref, o_ref):
    # Fused FFN block: LayerNorm(GELU(x @ W1 + b1) @ W2 + b2 + x).
    # The (TM, ffn_dim) intermediate stays in VMEM, in bf16.
    x = x_ref[...]
    h = jnp.dot(x.astype(jnp.bfloat16), w1_ref[...],
                preferred_element_type=jnp.float32) + b1_ref[...]
    h = _gelu_tanh(h.astype(jnp.bfloat16))            # bf16 intermediate
    y = jnp.dot(h, w2_ref[...],
                preferred_element_type=jnp.float32) + b2_ref[...]
    o_ref[...] = _layernorm(y + x.astype(jnp.float32),
                            g_ref[...], be_ref[...]).astype(o_ref.dtype)


def _mha_kernel(x_ref, wqkv_ref, bqkv_ref, wo_ref, bo_ref, *rest,
                num_heads, fuse_ln, mean_pool):
    # Per-batch multi-head self-attention (no mask); x block = (1, S, Din).
    # Q/K/V are one fused (Din, 3*Dm) matmul.  Optionally fuses the post-norm
    # residual LayerNorm and/or the final sequence-mean into the epilogue.
    if fuse_ln:
        g_ref, be_ref, o_ref, ctx_ref = rest
    else:
        o_ref, ctx_ref = rest

    x = x_ref[0]                                            # (S, Din)
    dm = wo_ref.shape[0]                                    # attention d_model
    hd = dm // num_heads
    scale = 1.0 / float(hd) ** 0.5

    xb = x.astype(jnp.bfloat16)
    qkv = jnp.dot(xb, wqkv_ref[...],
                  preferred_element_type=jnp.float32) + bqkv_ref[...]   # (S, 3*Dm)
    q = qkv[:, :dm]
    k = qkv[:, dm:2 * dm]
    v = qkv[:, 2 * dm:]

    # Each head's context is written into its slice of a (S, Dm) VMEM scratch
    # so the output projection is a single K = Dm matmul.
    # TODO(synk): for real sequence lengths, tile over KV blocks (flash-style
    # online softmax) and add a query-block "parallel" grid axis so v7x's
    # second TensorCore has work at small batch.
    # TODO(synk): at real head_dim=64, process heads in pairs so q/k/v slices
    # and ctx stores are 128-lane aligned (avoids masked sub-lane accesses).
    for h in range(num_heads):
        sl = slice(h * hd, (h + 1) * hd)
        qh = q[:, sl].astype(jnp.bfloat16)
        kh = k[:, sl].astype(jnp.bfloat16)
        vh = v[:, sl].astype(jnp.bfloat16)
        scores = jax.lax.dot_general(
            qh, kh, (((1,), (1,)), ((), ())),
            preferred_element_type=jnp.float32) * scale      # (S, S) f32
        scores = scores - jnp.max(scores, axis=-1, keepdims=True)
        p = jnp.exp(scores)
        # EUP reciprocal instead of a VALU divide over the (S, S) tile.
        p = p * pl.reciprocal(jnp.sum(p, axis=-1, keepdims=True), approx=True)
        ctx_ref[:, sl] = jnp.dot(p.astype(jnp.bfloat16), vh,
                                 preferred_element_type=jnp.float32)

    out = jnp.dot(ctx_ref[...].astype(jnp.bfloat16), wo_ref[...],
                  preferred_element_type=jnp.float32) + bo_ref[...]
    if fuse_ln:                      # post-norm residual + LayerNorm epilogue
        out = _layernorm(out + x.astype(jnp.float32), g_ref[...], be_ref[...])
    if mean_pool:                    # fused mean over the sequence dimension
        o_ref[0] = jnp.mean(out, axis=0, keepdims=True).astype(o_ref.dtype)
    else:
        o_ref[0] = out.astype(o_ref.dtype)


# ------------------------------ kernel wrappers -------------------------------
def pallas_embed_layernorm(x, pos, gamma, beta):
    b, s, d = x.shape
    return pl.pallas_call(
        _embed_ln_kernel,
        out_shape=jax.ShapeDtypeStruct((b, s, d), _ACT_DTYPE),
        grid=(b,),
        in_specs=[pl.BlockSpec((1, s, d), lambda i: (i, 0, 0)),
                  _resident_spec((s, d), lambda i: (0, 0)),      # pos, not broadcast
                  _resident_spec((1, d), lambda i: (0, 0)),
                  _resident_spec((1, d), lambda i: (0, 0))],
        out_specs=pl.BlockSpec((1, s, d), lambda i: (i, 0, 0)),
        compiler_params=_compiler_params("parallel"),
    )(x, pos, gamma.reshape(1, d), beta.reshape(1, d))


def pallas_ffn(x, w1, b1, w2, b2, gamma, beta):
    m, d = x.shape
    f = w1.shape[1]
    tm, steps = _row_tiling(m)
    return pl.pallas_call(
        _ffn_kernel,
        out_shape=jax.ShapeDtypeStruct((m, d), _ACT_DTYPE),
        grid=(steps,),
        in_specs=[pl.BlockSpec((tm, d), lambda i: (i, 0)),
                  _resident_spec((d, f), lambda i: (0, 0)),      # W1 resident
                  _resident_spec((1, f), lambda i: (0, 0)),
                  _resident_spec((f, d), lambda i: (0, 0)),      # W2 resident
                  _resident_spec((1, d), lambda i: (0, 0)),
                  _resident_spec((1, d), lambda i: (0, 0)),
                  _resident_spec((1, d), lambda i: (0, 0))],
        out_specs=pl.BlockSpec((tm, d), lambda i: (i, 0)),
        compiler_params=_compiler_params("parallel"),
    )(x, w1, b1.reshape(1, f), w2, b2.reshape(1, d),
      gamma.reshape(1, d), beta.reshape(1, d))


def pallas_mha(x, wqkv, bqkv, wo, bo, ln_g=None, ln_b=None, *,
               num_heads, fuse_ln, mean_pool):
    bsz, s, din = x.shape
    dm = wo.shape[0]
    assert dm % num_heads == 0

    in_specs = [pl.BlockSpec((1, s, din), lambda b: (b, 0, 0)),
                _resident_spec((din, 3 * dm), lambda b: (0, 0)),
                _resident_spec((1, 3 * dm), lambda b: (0, 0)),
                _resident_spec((dm, dm), lambda b: (0, 0)),
                _resident_spec((1, dm), lambda b: (0, 0))]
    args = [x, wqkv, bqkv.reshape(1, 3 * dm), wo, bo.reshape(1, dm)]
    if fuse_ln:
        in_specs += [_resident_spec((1, dm), lambda b: (0, 0)),
                     _resident_spec((1, dm), lambda b: (0, 0))]
        args += [ln_g.reshape(1, dm), ln_b.reshape(1, dm)]

    if mean_pool:
        out_shape = jax.ShapeDtypeStruct((bsz, 1, dm), jnp.float32)
        out_spec = pl.BlockSpec((1, 1, dm), lambda b: (b, 0, 0))
    else:
        out_shape = jax.ShapeDtypeStruct((bsz, s, dm), _ACT_DTYPE)
        out_spec = pl.BlockSpec((1, s, dm), lambda b: (b, 0, 0))

    out = pl.pallas_call(
        functools.partial(_mha_kernel, num_heads=num_heads,
                          fuse_ln=fuse_ln, mean_pool=mean_pool),
        out_shape=out_shape,
        grid=(bsz,),
        in_specs=in_specs,
        out_specs=out_spec,
        scratch_shapes=[pltpu.VMEM((s, dm), jnp.float32)],    # per-head ctx slab
        compiler_params=_compiler_params("parallel"),
    )(*args)
    return out.reshape(bsz, dm) if mean_pool else out


# ------------------------------ parameters ------------------------------------
def init_params(key, *, vocab_size, vocab_embed_size, hidden, n_layers,
                ffn_dim, max_pos, embed_size):
    # inputs_embeds must match the DistilBERT hidden size
    assert vocab_embed_size == hidden
    keys = iter(jax.random.split(key, 8 * n_layers + 16))

    def w32(shape, scale=0.02):
        return (scale * jax.random.normal(next(keys), shape)).astype(jnp.float32)

    def wbf(shape, scale=0.02):
        # matmul weights stored in bf16 (bf16 MXU path, half the HBM bytes)
        return w32(shape, scale).astype(jnp.bfloat16)

    zeros = lambda shape: jnp.zeros(shape, jnp.float32)
    ones = lambda shape: jnp.ones(shape, jnp.float32)

    layers = []
    for _ in range(n_layers):
        layers.append(dict(
            wqkv=wbf((hidden, 3 * hidden)), bqkv=zeros((3 * hidden,)),   # fused QKV
            wo=wbf((hidden, hidden)), bo=zeros((hidden,)),
            sa_ln_g=ones((hidden,)), sa_ln_b=zeros((hidden,)),
            w1=wbf((hidden, ffn_dim)), b1=zeros((ffn_dim,)),
            w2=wbf((ffn_dim, hidden)), b2=zeros((hidden,)),
            out_ln_g=ones((hidden,)), out_ln_b=zeros((hidden,)),
        ))

    return dict(
        emb=w32((vocab_size, vocab_embed_size)),       # nn.Embedding table
        pos=w32((max_pos, hidden)),                    # DistilBERT position embeddings
        emb_ln_g=ones((hidden,)), emb_ln_b=zeros((hidden,)),
        layers=layers,
        # out_linear kept in f32 so it can be folded exactly into the outer
        # attention's Q/K/V projections (no standalone linear kernel).
        w_out=w32((hidden, embed_size)), b_out=zeros((embed_size,)),
        att_wq=w32((embed_size, embed_size)), att_bq=zeros((embed_size,)),
        att_wk=w32((embed_size, embed_size)), att_bk=zeros((embed_size,)),
        att_wv=w32((embed_size, embed_size)), att_bv=zeros((embed_size,)),
        att_wo=wbf((embed_size, embed_size)), att_bo=zeros((embed_size,)),
    )


# ------------------------------ forward pass ----------------------------------
def distilbert_encoder_forward(params, token_ids, lengths, *,
                               n_heads_bert, n_heads_attn):
    del lengths  # accepted and ignored, matching the PyTorch forward
    b, s = token_ids.shape
    d = params["emb"].shape[1]

    # Embedding lookup (gather) — plain JAX glue.  Position embeddings are
    # passed as (S, D) to the fused add+LN kernel (no (B,S,D) materialization).
    x = jnp.take(params["emb"], token_ids, axis=0)                    # (B, S, D) f32
    h = pallas_embed_layernorm(x, params["pos"][:s],
                               params["emb_ln_g"], params["emb_ln_b"])  # bf16

    # Transformer blocks — 2 fused pallas_calls per layer.
    for lyr in params["layers"]:
        h = pallas_mha(h, lyr["wqkv"], lyr["bqkv"], lyr["wo"], lyr["bo"],
                       lyr["sa_ln_g"], lyr["sa_ln_b"],
                       num_heads=n_heads_bert, fuse_ln=True, mean_pool=False)
        h = pallas_ffn(h.reshape(b * s, d), lyr["w1"], lyr["b1"],
                       lyr["w2"], lyr["b2"],
                       lyr["out_ln_g"], lyr["out_ln_b"]).reshape(b, s, d)

    # Fold out_linear (hidden -> embed) into the outer attention's Q/K/V:
    #   (h @ Wout + bout) @ Wq + bq  ==  h @ (Wout @ Wq) + (bout @ Wq + bq)
    # This removes the (B, S, E) HBM intermediate and one kernel launch.
    def fold(w_att, b_att):
        return params["w_out"] @ w_att, params["b_out"] @ w_att + b_att

    wq, bq = fold(params["att_wq"], params["att_bq"])
    wk, bk = fold(params["att_wk"], params["att_bk"])
    wv, bv = fold(params["att_wv"], params["att_bv"])
    wqkv = jnp.concatenate([wq, wk, wv], axis=1).astype(jnp.bfloat16)   # (D, 3E)
    bqkv = jnp.concatenate([bq, bk, bv], axis=0)                        # (3E,)

    # Outer MultiHeadAttention(embed_size, 8 heads), self-attention, no mask,
    # with the mean over the sequence dimension fused into the kernel epilogue.
    return pallas_mha(h, wqkv, bqkv, params["att_wo"], params["att_bo"],
                      num_heads=n_heads_attn, fuse_ln=False, mean_pool=True)


# ---------------------------------- main --------------------------------------
if __name__ == "__main__":
    # Scaled-down synthetic DistilBERT config (real: hidden=768, 6 layers,
    # 12 heads, ffn=3072).
    VOCAB_SIZE = 100
    HIDDEN = 32            # DistilBERT hidden size
    VOCAB_EMBED = HIDDEN   # vocab_embed_size must equal hidden for inputs_embeds
    EMBED_SIZE = 64        # encoder output embed_size (divisible by 8 heads)
    N_LAYERS = 2
    N_HEADS_BERT = 4
    FFN_DIM = 64
    MAX_POS = 16
    B, S = 2, 8

    root = jax.random.PRNGKey(0)
    pkey, ikey = jax.random.split(root)
    params = init_params(pkey, vocab_size=VOCAB_SIZE, vocab_embed_size=VOCAB_EMBED,
                         hidden=HIDDEN, n_layers=N_LAYERS, ffn_dim=FFN_DIM,
                         max_pos=MAX_POS, embed_size=EMBED_SIZE)

    token_ids = jax.random.randint(ikey, (B, S), 0, VOCAB_SIZE, dtype=jnp.int32)
    lengths = jnp.full((B,), S, dtype=jnp.int32)

    out = distilbert_encoder_forward(params, token_ids, lengths,
                                     n_heads_bert=N_HEADS_BERT, n_heads_attn=8)
    out = jax.block_until_ready(out)
    assert out.shape == (B, EMBED_SIZE) and out.dtype == jnp.float32
    assert bool(jnp.all(jnp.isfinite(out)))
    print("KERNEL_OK")
</pallas_src>

<mosaic_0001>
module attributes {stable_mosaic.version = 11 : i64} {
  func.func @_sb_probe_kernel(%arg0: i32, %arg1: memref<8x128xf32, #tpu.memory_space<vmem>>, %arg2: memref<8x128xf32, #tpu.memory_space<vmem>>) attributes {dimension_semantics = [#tpu.dimension_semantics<arbitrary>], iteration_bounds = array<i64: 1>, scalar_prefetch = 0 : i64, scratch_operands = 0 : i64, tpu.core_type = #tpu.core_type<tc>, window_params = [{pipeline_mode = #tpu.pipeline_mode<synchronous>, transform_indices = @transform_0, window_bounds = array<i64: 8, 128>}, {pipeline_mode = #tpu.pipeline_mode<synchronous>, transform_indices = @transform_1, window_bounds = array<i64: 8, 128>}]} {
    %c0 = arith.constant 0 : index
    %c0_0 = arith.constant 0 : index
    %0 = vector.load %arg1[%c0, %c0_0] : memref<8x128xf32, #tpu.memory_space<vmem>>, vector<8x128xf32>
    %cst = arith.constant 1.000000e+00 : f32
    %1 = vector.broadcast %cst : f32 to vector<8x128xf32>
    %2 = arith.addf %0, %1 : vector<8x128xf32>
    %c0_1 = arith.constant 0 : index
    %c0_2 = arith.constant 0 : index
    %3 = vector.load %arg2[%c0_1, %c0_2] : memref<8x128xf32, #tpu.memory_space<vmem>>, vector<8x128xf32>
    tpu.vector_store %arg2[%c0_1, %c0_2], %2 {strides = array<i32>} : memref<8x128xf32, #tpu.memory_space<vmem>>, vector<8x128xf32>,
    return
  }
  func.func @transform_0(%arg0: i32) -> (i32, i32) {
    %c0_i32 = arith.constant 0 : i32
    %c0_i32_0 = arith.constant 0 : i32
    %c0_i32_1 = arith.constant 0 : i32
    return %c0_i32, %c0_i32_0 : i32, i32
  }
  func.func @transform_1(%arg0: i32) -> (i32, i32) {
    %c0_i32 = arith.constant 0 : i32
    %c0_i32_0 = arith.constant 0 : i32
    %c0_i32_1 = arith.constant 0 : i32
    return %c0_i32, %c0_i32_0 : i32, i32
  }
}

module attributes {stable_mosaic.version = 11 : i64} {
  func.func @_embed_ln_kernel(%arg0: i32, %arg1: memref<1x8x32xf32, #tpu.memory_space<vmem>>, %arg2: memref<8x32xf32, #tpu.memory_space<vmem>>, %arg3: memref<1x32xf32, #tpu.memory_space<vmem>>, %arg4: memref<1x32xf32, #tpu.memory_space<vmem>>, %arg5: memref<1x8x32xbf16, #tpu.memory_space<vmem>>) attributes {dimension_semantics = [#tpu.dimension_semantics<parallel>], iteration_bounds = array<i64: 2>, scalar_prefetch = 0 : i64, scratch_operands = 0 : i64, tpu.core_type = #tpu.core_type<tc>, window_params = [{transform_indices = @transform_0, window_bounds = array<i64: 1, 8, 32>}, {pipeline_mode = #tpu.pipeline_mode<synchronous>, transform_indices = @transform_1, window_bounds = array<i64: 8, 32>}, {pipeline_mode = #tpu.pipeline_mode<synchronous>, transform_indices = @transform_2, window_bounds = array<i64: 1, 32>}, {pipeline_mode = #tpu.pipeline_mode<synchronous>, transform_indices = @transform_3, window_bounds = array<i64: 1, 32>}, {transform_indices = @transform_4, window_bounds = array<i64: 1, 8, 32>}]} {
    %c0 = arith.constant 0 : index
    %c0_0 = arith.constant 0 : index
    %c0_1 = arith.constant 0 : index
    %0 = vector.load %arg1[%c0, %c0_0, %c0_1] : memref<1x8x32xf32, #tpu.memory_space<vmem>>, vector<1x8x32xf32>
    %1 = vector.shape_cast %0 : vector<1x8x32xf32> to vector<8x32xf32>
    %c0_2 = arith.constant 0 : index
    %c0_3 = arith.constant 0 : index
    %2 = vector.load %arg2[%c0_2, %c0_3] : memref<8x32xf32, #tpu.memory_space<vmem>>, vector<8x32xf32>
    %3 = arith.addf %1, %2 : vector<8x32xf32>
    %c0_4 = arith.constant 0 : index
    %c0_5 = arith.constant 0 : index
    %4 = vector.load %arg3[%c0_4, %c0_5] : memref<1x32xf32, #tpu.memory_space<vmem>>, vector<1x32xf32>
    %c0_6 = arith.constant 0 : index
    %c0_7 = arith.constant 0 : index
    %5 = vector.load %arg4[%c0_6, %c0_7] : memref<1x32xf32, #tpu.memory_space<vmem>>, vector<1x32xf32>
    %cst = arith.constant dense<0.000000e+00> : vector<8xf32>
    %6 = vector.multi_reduction <add>, %3, %cst [1] : vector<8x32xf32> to vector<8xf32>
    %7 = vector.shape_cast %6 : vector<8xf32> to vector<8x1xf32>
    %cst_8 = arith.constant 3.200000e+01 : f32
    %8 = vector.broadcast %cst_8 : f32 to vector<8x1xf32>
    %9 = arith.divf %7, %8 : vector<8x1xf32>
    %10 = vector.broadcast %9 : vector<8x1xf32> to vector<8x32xf32>
    %11 = arith.subf %3, %10 : vector<8x32xf32>
    %12 = arith.mulf %11, %11 : vector<8x32xf32>
    %cst_9 = arith.constant dense<0.000000e+00> : vector<8xf32>
    %13 = vector.multi_reduction <add>, %12, %cst_9 [1] : vector<8x32xf32> to vector<8xf32>
    %14 = vector.shape_cast %13 : vector<8xf32> to vector<8x1xf32>
    %cst_10 = arith.constant 3.200000e+01 : f32
    %15 = vector.broadcast %cst_10 : f32 to vector<8x1xf32>
    %16 = arith.divf %14, %15 : vector<8x1xf32>
    %17 = vector.broadcast %9 : vector<8x1xf32> to vector<8x32xf32>
    %18 = arith.subf %3, %17 : vector<8x32xf32>
    %cst_11 = arith.constant 9.99999996E-13 : f32
    %19 = vector.broadcast %cst_11 : f32 to vector<8x1xf32>
    %20 = arith.addf %16, %19 : vector<8x1xf32>
    %21 = math.rsqrt %20 : vector<8x1xf32>
    %22 = vector.broadcast %21 : vector<8x1xf32> to vector<8x32xf32>
    %23 = arith.mulf %18, %22 : vector<8x32xf32>
    %24 = vector.broadcast %4 : vector<1x32xf32> to vector<8x32xf32>
    %25 = arith.mulf %23, %24 : vector<8x32xf32>
    %26 = vector.broadcast %5 : vector<1x32xf32> to vector<8x32xf32>
    %27 = arith.addf %25, %26 : vector<8x32xf32>
    %28 = arith.truncf %27 : vector<8x32xf32> to vector<8x32xbf16>
    %c0_12 = arith.constant 0 : index
    %c0_13 = arith.constant 0 : index
    %c0_14 = arith.constant 0 : index
    %29 = vector.load %arg5[%c0_12, %c0_13, %c0_14] : memref<1x8x32xbf16, #tpu.memory_space<vmem>>, vector<1x8x32xbf16>
    %30 = vector.shape_cast %29 : vector<1x8x32xbf16> to vector<8x32xbf16>
    %31 = vector.shape_cast %28 : vector<8x32xbf16> to vector<1x8x32xbf16>
    tpu.vector_store %arg5[%c0_12, %c0_13, %c0_14], %31 {strides = array<i32>} : memref<1x8x32xbf16, #tpu.memory_space<vmem>>, vector<1x8x32xbf16>,
    return
  }
  func.func @transform_0(%arg0: i32) -> (i32, i32, i32) {
    %c0_i32 = arith.constant 0 : i32
    %c0_i32_0 = arith.constant 0 : i32
    %c0_i32_1 = arith.constant 0 : i32
    return %arg0, %c0_i32, %c0_i32_0 : i32, i32, i32
  }
  func.func @transform_1(%arg0: i32) -> (i32, i32) {
    %c0_i32 = arith.constant 0 : i32
    %c0_i32_0 = arith.constant 0 : i32
    %c0_i32_1 = arith.constant 0 : i32
    return %c0_i32, %c0_i32_0 : i32, i32
  }
  func.func @transform_2(%arg0: i32) -> (i32, i32) {
    %c0_i32 = arith.constant 0 : i32
    %c0_i32_0 = arith.constant 0 : i32
    %c0_i32_1 = arith.constant 0 : i32
    return %c0_i32, %c0_i32_0 : i32, i32
  }
  func.func @transform_3(%arg0: i32) -> (i32, i32) {
    %c0_i32 = arith.constant 0 : i32
    %c0_i32_0 = arith.constant 0 : i32
    %c0_i32_1 = arith.constant 0 : i32
    return %c0_i32, %c0_i32_0 : i32, i32
  }
  func.func @transform_4(%arg0: i32) -> (i32, i32, i32) {
    %c0_i32 = arith.constant 0 : i32
    %c0_i32_0 = arith.constant 0 : i32
    %c0_i32_1 = arith.constant 0 : i32
    return %arg0, %c0_i32, %c0_i32_0 : i32, i32, i32
  }
}

</mosaic_0001>

<bundles_post_ra>
// kernel: tpu_custom_call.1
= control target key start
LH: loop header
LB: loop body
LE: loop exit
PB: predicated region body
PF: predicated region fallthrough
CT: control target
= control target key end

     0   :  { %6 = vsyncpa [#allocation3], 0  ;;  %s115_s0 = inlined_call_operand.hbm [shape: f32[8,128], index: 0, kind: input, shape index: {}]   ;;  %s116_s1 = inlined_call_operand.hbm [shape: f32[8,128], index: 1, kind: output, shape index: {}]  }
   0x1   :  { %7 = vsyncpa [#allocation4], 0  ;;  %s13_s8 = sshll.u32 %s115_s0, 4  ;;  %s97_s9 = smov [#allocation2]   ;;  %s14_s8 = int_to_ptr.hbm [resolvable:$true] %s13_s8 }
   0x2   :  { %s15_s10 = sshll.u32 %s97_s9, 4  ;;  %s16_s10 = int_to_ptr.vmem [resolvable:$true] %s15_s10 }
   0x3   :  { %18 = dma.hbm_to_vmem [thread:$0]  %s14_s8, 128, %s16_s10, [#allocation3]  }
   0x4   :  { %93 = dma.done.wait [#allocation3], 128  }
   0x5   :  { %94 = vsyncadd [#allocation3], 4294967168  ;;  %s98_s11 = smov [#allocation5]   ;;  %s33_s15 = sshll.u32 %s116_s1, 4  ;;  %v23_v0 = vld [vmem:[#allocation2] sm:$0xff]  ;;  %s34_s15 = int_to_ptr.hbm [resolvable:$true] %s33_s15 }
   0x6   :  { %s31_s12 = sshll.u32 %s98_s11, 4  ;;  %v24_v1 = vadd.f32 1.0, %v23_v0  ;;  %s32_s12 = int_to_ptr.vmem [resolvable:$true] %s31_s12 }
   0x8   :  { %25 = vst [vmem:[#allocation5] sm:$0xff] %v24_v1 }
   0x9   :  { %36 = dma.vmem_to_hbm [thread:$0]  %s32_s12, 128, %s34_s15, [#allocation4]  }
   0xa   :  { %95 = dma.done.wait [#allocation4], 128  }
   0xb   :  { %96 = vsyncadd [#allocation4], 4294967168 }
   0xc   :  { %41 = vsyncpa [#allocation3], 1 }
   0xd   :  { %42 = vsyncpa [#allocation4], 1 }

// kernel: tpu_custom_call.1
= control target key start
LH: loop header
LB: loop body
LE: loop exit
PB: predicated region body
PF: predicated region fallthrough
CT: control target
= control target key end

     0   :  { %9 = vsyncpa [#allocation3], 0  ;;  %s756_s0 = inlined_call_operand.hbm [shape: f32[2,8,32], index: 0, kind: input, shape index: {}]   ;;  %s757_s1 = inlined_call_operand.hbm [shape: f32[8,32], index: 1, kind: input, shape index: {}]   ;;  %s758_s2 = inlined_call_operand.vmem [shape: f32[1,32], index: 2, kind: input, shape index: {}]   ;;  %s759_s3 = inlined_call_operand.vmem [shape: f32[1,32], index: 3, kind: input, shape index: {}]   ;;  %s760_s4 = inlined_call_operand.hbm [shape: bf16[2,8,32], index: 4, kind: output, shape index: {}]  }
   0x1   :  { %11 = vsyncpa [#allocation3 + $0x1], 0 }
   0x2   :  { %12 = vsyncpa [#allocation6], 0 }
   0x3   :  { %13 = vsyncpa [#allocation4], 0 }
   0x4   :  { %15 = vsyncpa [#allocation4 + $0x1], 0  ;;  %s609_s15 = smov 0   ;;  %s611_s16 = smov 0  }
   0x5   :  { %s613_s17 = smov 0   ;;  %s615_s18 = smov 0  }
   0x6 LB: > { %s630_s19 = sadd.s32 4294967295, %s580_s18   ;;  %s372_s20 = sadd.s32 4294967294, %s580_s18   ;;  %s580_s18 = sphi %s615_s18, %s770_s18   ;;  %s576_s17 = sphi %s613_s17, %s769_s17   ;;  %s572_s16 = sphi %s611_s16, %s768_s16   ;;  %s568_s15 = sphi %s609_s15, %s767_s15  }
   0x7   : > { %p41_p0 = scmp.ne.s32.totalorder %s572_s16, %s568_s15  ;;  %p42_p1 = scmp.eq.s32.totalorder %s630_s19, 0 }
   0x8   : > { %p128_p2 = scmp.eq.s32.totalorder %s630_s19, 1  ;;  %p134_p3 = scmp.eq.s32.totalorder %s372_s20, 1 }
   0x9   : > { %p639_p4 = por %p42_p1, %p41_p0  ;;  %p373_p5 = scmp.ge.s32.totalorder %s580_s18, 1 }
   0xa   : > { %p644_p6 = por %p134_p3, %p41_p0  ;;  %p141_p7 = scmp.lt.s32.totalorder %s580_s18, 3 }
   0xb   : > { %s153_s25 = sshll.u32 %s757_s1, 4  ;;  %s582_s27 = smov [#allocation5]   ;;  %s154_s25 = int_to_ptr.hbm [resolvable:$true] %s153_s25 }
   0xc   : > { %p652_p8 = pnand %p373_p5, %p141_p7  ;;  %s155_s28 = sshll.u32 %s582_s27, 4  ;;  %s156_s28 = int_to_ptr.vmem [resolvable:$true] %s155_s28 }
   0xd   : > { %s662_s29 = sadd.s32 1, %s580_s18   ;;  %s28_s30 = sadd.s32 1, %s576_s17 }
   0xe   : > { %p394_p10 = pneg %p652_p8  ;;  %s25_s5 = ssub.s32 %s580_s18, %s662_s29 }
   0xf   : > { %p26_p12 = scmp.eq.s32.totalorder %s25_s5, 0  ;;  %p35_p13 = scmp.ne.s32.totalorder %s576_s17, %s572_s16 }
  0x10   : > { %p395_p11 = pnand %p394_p10, %p42_p1  ;;  %p36_p0 = scmp.eq.s32.totalorder %s580_s18, 0 }
  0x11   : > { %s671_s6 = scalar_select %p26_p12, %s576_s17, %s28_s30  }
  0x12   : > { %397 = dma.hbm_to_vmem [thread:$0]  (!%p395_p11), %s154_s25, 128, %s156_s28, [#allocation6]  }
  0x13   : > { %p675_p3 = por %p128_p2, %p35_p13  ;;  %p407_p5 = scmp.lt.s32.totalorder %s580_s18, 2 }
  0x14   : > { %s172_s8 = sand.u32 1, %s576_s17   ;;  %s377_s9 = sshll.u32 %s580_s18, 3 }
  0x15   : > { %p37_p7 = por %p36_p0, %p35_p13  ;;  %s376_s10 = sshll.u32 %s172_s8, 3 }
  0x16   : > { %s180_s13 = scalar_lea.hbm %s756_s0, %s377_s9  ;;  %s176_s20 = scalar_lea.vmem [#allocation2], %s376_s10 }
  0x17   : > { %s182_s14 = sshll.u32 %s180_s13, 4  ;;  %s184_s23 = sshll.u32 %s176_s20, 4  ;;  %s183_s14 = int_to_ptr.hbm [resolvable:$true] %s182_s14  ;;  %s185_s23 = int_to_ptr.vmem [resolvable:$true] %s184_s23 }
  0x18   : > { %p685_p10 = pnand %p407_p5, %p37_p7  ;;  %s173_s25 = scalar_lea.sflag [#allocation3], %s172_s8 }
  0x19   : > { %s480_s27 = sshra.s32 %s183_s14, 4  ;;  %s487_s9 = scalar_lea.hbm %s756_s0, 16  ;;  %s481_s27 = int_to_ptr.hbm [resolvable:$true] %s480_s27 }
  0x1a   : > { %s482_s28 = scalar_lea.hbm %s481_s27, 8  ;;  %p484_p11 = pneg %p685_p10 }
  0x1b   : > { %p483_p2 = scmp.ne.s32.totalorder %s481_s27, %s482_s28  ;;  %p488_p0 = scmp.lt.s32.totalorder %s481_s27, %s756_s0 }
  0x1c   : > { %p489_p5 = scmp.lt.s32.totalorder %s487_s9, %s482_s28 }
  0x1d   : > { %p485_p12 = pnand %p484_p11, %p483_p2 }
  0x1e   : > { %p490_p7 = por %p489_p5, %p488_p0 }
  0x1f   : > { %p486_p13 = pneg %p485_p12 }
  0x21   : > { %p491_p9 = pnand %p490_p7, %p486_p13 }
  0x23   : > { %494 = shalt.err (!%p491_p9)
}
  0x24   : > { %401 = dma.hbm_to_vmem [thread:$0]  (!%p685_p10), %s183_s14, 128, %s185_s23, %s173_s25  }
  0x25   : > { %193 = sbr.rel (%p652_p8) target bundleno = 321 (0x141), region = 36  ;;  %s702_s8 = sand.u32 (!%p652_p8), 1, %s572_s16  }
  0x26   : > { %s379_s12 = sshll.u32 (!%p652_p8), %s702_s8, 3  ;;  %s196_s13 = scalar_lea.sflag (!%p652_p8), [#allocation3], %s702_s8 }
  0x27   : > { %s199_s20 = scalar_lea.vmem (!%p652_p8), [#allocation2], %s379_s12 }
  0x2a   : > { %555 = dma.done.wait (%p639_p4), %s196_s13, 128  }
  0x2b   : > { %557 = vsyncadd (%p639_p4), %s196_s13, 4294967168 }
  0x2c   : > { %559 = dma.done.wait (%p42_p1), [#allocation6], 128  }
  0x2d   : > { %561 = vsyncadd (%p42_p1), [#allocation6], 4294967168  ;;  %v230_v0 = vld [vmem:[%s199_s20] sm:$0xff]  ;;  %v231_v1 = vld [vmem:[#allocation5] sm:$0xff]  ;;  %vm235_vm0 = vcmask 261120   ;;  %v583_v4 = vmov 32.0  }
  0x2e   : > { %v232_v2 = vadd.f32 %v231_v1, %v230_v0  ;;  %446 = vrcp.f32 %v583_v4  ;;  %s381_s21 = sshll.u32 %s702_s8, 2  ;;  %s383_s26 = sshll.u32 %s630_s19, 2  ;;  %v444_v25 = vld [vmem:[%s758_s2] ss:$0 sm:$0xff]  ;;  %vm274_vm5 = vcmask 257024  }
  0x2f   : > { %v445_v27 = vld [vmem:[%s759_s3] ss:$0 sm:$0xff]  ;;  %s287_s30 = scalar_lea.hbm %s760_s4, %s383_s26  ;;  %s229_s5 = scalar_lea.vmem [#allocation7], %s381_s21 }
  0x30   : > { %v236_v3 = vsel %vm235_vm0, %v232_v2, 0.0  ;;  %s289_s19 = sshll.u32 %s229_s5, 4  ;;  %s291_s9 = sshll.u32 %s287_s30, 4  ;;  %s290_s19 = int_to_ptr.vmem [resolvable:$true] %s289_s19  ;;  %s292_s9 = int_to_ptr.hbm [resolvable:$true] %s291_s9 }
  0x31   : > { %237 = vadd.xlane.f32.xlu0 %v236_v3  ;;  %s277_s10 = scalar_lea.sflag [#allocation4], %s702_s8  ;;  %s524_s11 = sshra.s32 %s292_s9, 4  ;;  %s525_s11 = int_to_ptr.hbm [resolvable:$true] %s524_s11 }
  0x32   : > { %s526_s12 = scalar_lea.hbm %s525_s11, 4  ;;  %s530_s21 = scalar_lea.hbm %s760_s4, 8 }
  0x33   : > { %p527_p1 = scmp.ne.s32.totalorder %s525_s11, %s526_s12  ;;  %p531_p9 = scmp.lt.s32.totalorder %s525_s11, %s760_s4 }
  0x34   : > { %v447_v5 = vpop.eup %446  ;;  %p532_p10 = scmp.lt.s32.totalorder %s530_s21, %s526_s12 }
  0x35   : > { %v240_v6 = vmul.f32 32.0, %v447_v5  ;;  %vm244_vm1 = vweird.f32 %v447_v5  ;;  %p528_p4 = pnand %p527_p1, %p675_p3 }
  0x36   : > { %p533_p2 = por %p532_p10, %p531_p9 }
  0x37   : > { %v241_v7 = vsub.f32 1.0, %v240_v6  ;;  %p529_p8 = pneg %p528_p4 }
  0x39   : > { %v242_v8 = vmul.f32 %v447_v5, %v241_v7  ;;  %p534_p11 = pnand %p533_p2, %p529_p8 }
  0x3b   : > { %v243_v9 = vadd.f32 %v447_v5, %v242_v8 }
  0x3d   : > { %v245_v10 = vsel %vm244_vm1, %v447_v5, %v243_v9 }
  0xa4   : > { %v238_v11 = vpop.xlane.xlu0 %237 }
  0xa5   : > { %v246_v12 = vmul.f32 %v245_v10, %v238_v11 }
  0xa7   : > { %v247_v13 = vsub.f32 %v232_v2, %v246_v12 }
  0xa9   : > { %v248_v14 = vmul.f32 %v247_v13, %v247_v13 }
  0xab   : > { %v249_v15 = vsel %vm235_vm0, %v248_v14, 0.0 }
  0xac   : > { %250 = vadd.xlane.f32.xlu0 %v249_v15 }
 0x11f   : > { %v251_v16 = vpop.xlane.xlu0 %250 }
 0x120   : > { %v252_v17 = vmul.f32 %v251_v16, %v245_v10 }
 0x122   : > { %v253_v18 = vadd.f32 1e-12, %v252_v17 }
 0x124   : > { %448 = vrsqrt.f32 %v253_v18  ;;  %vm260_vm3 = vweird.f32 %v253_v18 }
 0x12a   : > { %v449_v19 = vpop.eup %448 }
 0x12b   : > { %v255_v20 = vmul.f32 %v449_v19, %v253_v18  ;;  %vm261_vm2 = vweird.f32 %v449_v19 }
 0x12c   : > { %vm262_vm4 = vmor %vm260_vm3, %vm261_vm2 }
 0x12d   : > { %v256_v21 = vmul.f32 %v449_v19, %v255_v20 }
 0x12f   : > { %v257_v22 = vmul.f32 0.5, %v256_v21 }
 0x131   : > { %v258_v23 = vsub.f32 1.5, %v257_v22 }
 0x133   : > { %v259_v24 = vmul.f32 %v449_v19, %v258_v23 }
 0x135   : > { %v263_v26 = vsel %vm262_vm4, %v449_v19, %v259_v24 }
 0x136   : > { %v264_v28 = vmul.f32 %v263_v26, %v247_v13 }
 0x138   : > { %v268_v29 = vmul.f32 %v444_v25, %v264_v28 }
 0x13a   : > { %v272_v30 = vadd.f32 %v445_v27, %v268_v29 }
 0x13c   : > { %v273_v31 = vpack.c.bf16 %v272_v30, %v272_v30 }
 0x13e   : > { %275 = vst.msk [vmem:[%s229_s5] sm:$0xf] %vm274_vm5, %v273_v31 }
 0x13f   : > { %537 = shalt.err (!%p534_p11)
}
 0x140   : > { %392 = dma.vmem_to_hbm [thread:$0]  (%p675_p3), %s290_s19, 64, %s292_s9, %s277_s10  }
 0x141 PF: > { %s303_s8 = sand.u32 1, %s568_s15   ;;  %p766_p12 = scmp.ge.s32.totalorder %s580_s18, 2 }
 0x142   : > { %s304_s23 = scalar_lea.sflag [#allocation4], %s303_s8 }
 0x143   : > { %p403_p13 = pnand %p766_p12, %p644_p6 }
 0x145   : > { %p404_p0 = pneg %p403_p13 }
 0x147   : > { %563 = dma.done.wait (%p404_p0), %s304_s23, 64  }
 0x148   : > { %565 = vsyncadd (%p404_p0), %s304_s23, 4294967232  ;;  %p18_p5 = scmp.ge.s32.totalorder %s662_s29, 4   ;;  %s767_s15 = smov %s572_s16 }
 0x149   : > { %s768_s16 = smov %s576_s17  ;;  %s769_s17 = smov %s671_s6 }
 0x14a   : > { %s770_s18 = smov %s662_s29  ;;  %20 = sbr.rel (!%p18_p5) target bundleno = 6 (0x6), region = 85 }
 0x14f   :  { %310 = vsyncpa [#allocation3], 1 }
 0x150   :  { %312 = vsyncpa [#allocation3 + $0x1], 1 }
 0x151   :  { %313 = vsyncpa [#allocation6], 1 }
 0x152   :  { %314 = vsyncpa [#allocation4], 1 }
 0x153   :  { %316 = vsyncpa [#allocation4 + $0x1], 1 }

</bundles_post_ra>
